<compile_context>
chip_gen: v5e
topology: v5e:2x2
jax: 0.10.0
libtpu: 0.0.40
codegen_flags: <defaults>
</compile_context>

<pallas_src>
import functools
import math

import jax
import jax.numpy as jnp
from jax import lax
from jax.experimental import pallas as pl
from jax.experimental.pallas import tpu as pltpu


def _round_up(a, m):
    return ((a + m - 1) // m) * m


def _chip_info():
    """Per-generation knobs from a trace-time hardware query (safe fallback)."""
    phys = 64 << 20                                 # conservative default (v7x/TC)
    try:
        phys = int(pltpu.get_tpu_info().vmem_capacity_bytes)
    except Exception:
        pass
    two_cores = phys <= (64 << 20)                  # v7x heuristic: 64 MiB/TC, 2 TCs
    return {
        "two_cores": two_cores,
        # explicit scoped-VMEM request (defaults are 16/32 MiB; physical 64/128)
        "vmem_limit": int(min(phys // 2, 64 << 20)),
        # rough f32-matmul flops-per-HBM-byte ridge point for path selection
        "ridge": 75.0 if two_cores else 60.0,
    }


def _pick_tile(total, budget_rows, pad_gran):
    """Tile rows: whole array if it fits; else a divisor of `total` near the
    budget (no pad / no output-slice round trip); else pad to a multiple."""
    if total <= budget_rows:
        return total, total
    best = 0
    for d in range(budget_rows, 7, -1):
        if total % d == 0 and d % 8 == 0:
            best = d
            break
    if best * 2 >= budget_rows:
        return best, total
    tb = max(pad_gran, budget_rows // pad_gran * pad_gran)
    return tb, _round_up(total, tb)


# ---------------------------------------------------------------------------
# Path 1 (small graphs): fused single-matmul kernel.
#   out_row = x_row @ kron(gso^T, W) + tile(bias, N)    (lane-padded to 128)
# ---------------------------------------------------------------------------
def _fused_kernel(x_ref, m_ref, b_ref, o_ref):
    # x_ref: (tb, K)   m_ref: (K, L_pad)   b_ref: (1, L_pad)   o_ref: (tb, L_pad)
    y = jnp.dot(x_ref[...], m_ref[...], preferred_element_type=jnp.float32)
    o_ref[...] = (y + b_ref[...]).astype(o_ref.dtype)


def _graph_conv_fused(x_flat, gso, weight, bias, *, BT, N, c_in, c_out, chip,
                      compute_dtype=None, tile_rows=None):
    K, L = N * c_in, N * c_out
    L_pad = _round_up(L, 128)          # lane-dense output -> unmasked stores

    # M[i*c_in + k, h*c_out + j] = gso[h, i] * weight[k, j]   (== kron(gso^T, W))
    kron = jnp.einsum('hi,kj->ikhj', gso, weight).reshape(K, L)
    bias_row = jnp.tile(bias, N)
    if L_pad != L:
        kron = jnp.pad(kron, ((0, 0), (0, L_pad - L)))
        bias_row = jnp.pad(bias_row, (0, L_pad - L))
    bias_row = bias_row.reshape(1, L_pad)

    if compute_dtype is not None:      # optional bf16 streaming, f32 accumulation
        x_flat = x_flat.astype(compute_dtype)
        kron = kron.astype(compute_dtype)

    # --- VMEM-aware tile sizing (per generation) ---
    in_bytes = x_flat.dtype.itemsize
    kron_bytes = kron.size * kron.dtype.itemsize
    row_bytes = in_bytes * K + 4 * L_pad            # one streamed row (in + out)
    budget = int(chip["vmem_limit"] * 0.75) - 2 * kron_bytes - (1 << 20)
    tb_budget = min(8192, max(256, (budget // (2 * row_bytes)) // 256 * 256))
    if chip["two_cores"] and BT >= 512:
        # keep >= 2 grid steps only where megacore sharding exists (v7x)
        tb_budget = min(tb_budget, max(256, _round_up(pl.cdiv(BT, 2), 256)))

    if tile_rows is not None:
        tb, bt_pad = tile_rows, _round_up(BT, tile_rows)
    else:
        tb, bt_pad = _pick_tile(BT, tb_budget, 256)
    if bt_pad != BT:
        x_flat = jnp.pad(x_flat, ((0, bt_pad - BT), (0, 0)))

    out = pl.pallas_call(
        _fused_kernel,
        out_shape=jax.ShapeDtypeStruct((bt_pad, L_pad), jnp.float32),
        grid_spec=pltpu.PrefetchScalarGridSpec(
            num_scalar_prefetch=0,
            grid=(bt_pad // tb,),
            in_specs=[
                pl.BlockSpec((tb, K), lambda i: (i, 0)),       # x rows (lane-dense)
                pl.BlockSpec((K, L_pad), lambda i: (0, 0)),    # fused gso (x) W
                pl.BlockSpec((1, L_pad), lambda i: (0, 0)),    # bias row
            ],
            out_specs=pl.BlockSpec((tb, L_pad), lambda i: (i, 0)),
        ),
        compiler_params=pltpu.CompilerParams(
            dimension_semantics=("parallel",),
            vmem_limit_bytes=chip["vmem_limit"],
            # let XLA fold the NCHW permute/reshape into the x input DMA
            allow_input_fusion=[True, False, False],
        ),
    )(x_flat, kron, bias_row)

    if bt_pad != BT or L_pad != L:
        out = out[:BT, :L]             # one fused XLA slice (row tail + lane pad)
    return out


# ---------------------------------------------------------------------------
# Path 2 (large graphs): two-matmul kernel; channel-mix hoisted to one big
# MXU matmul per tile, per-slice gso matmuls partially unrolled.
# ---------------------------------------------------------------------------
def _general_kernel(gso_ref, w_ref, b_ref, x_ref, o_ref, tmp_ref, *,
                    tb, n, w_first):
    g = gso_ref[...]
    w = w_ref[...]
    b = b_ref[...]
    if w_first:  # c_out <= c_in: channel mix first (cheaper), hoisted
        tmp_ref[...] = jnp.dot(
            x_ref[...].reshape(tb * n, -1), w,
            preferred_element_type=jnp.float32).reshape(tb, n, -1)

        def body(s, carry):
            o_ref[s] = (jnp.dot(g, tmp_ref[s], preferred_element_type=jnp.float32)
                        + b).astype(o_ref.dtype)
            return carry
        lax.fori_loop(0, tb, body, 0, unroll=8)
    else:        # c_in < c_out: gso first, then one hoisted channel-mix matmul
        def body(s, carry):
            tmp_ref[s] = jnp.dot(g, x_ref[s], preferred_element_type=jnp.float32)
            return carry
        lax.fori_loop(0, tb, body, 0, unroll=8)
        y = jnp.dot(tmp_ref[...].reshape(tb * n, -1), w,
                    preferred_element_type=jnp.float32).reshape(tb, n, -1)
        o_ref[...] = (y + b).astype(o_ref.dtype)


def _graph_conv_general(x_3d, gso, weight, bias, *, BT, N, c_in, c_out, chip,
                        tile_rows=None):
    # TODO(synk): for very large N, tile gso over vertices and move N onto the
    # lane axis (lane-dense (tb, c, N) blocks) instead of keeping whole-gso in
    # VMEM and c_out-wide (masked) output rows.
    bias_row = bias.reshape(1, c_out)
    w_first = c_out <= c_in
    c_mid = c_out if w_first else c_in

    lane = lambda c: _round_up(c, 128)
    # per bt-slice VMEM (minor dims pad to 128 lanes): 2x-buffered x/out + scratch
    row_bytes = 4 * N * (2 * lane(c_in) + 2 * lane(c_out) + lane(c_mid))
    fixed = 8 * (_round_up(N, 8) * lane(N)
                 + _round_up(c_in, 8) * lane(c_out) + lane(c_out))
    budget = int(chip["vmem_limit"] * 0.7) - fixed - (1 << 20)
    tb_budget = min(1024, max(8, (budget // row_bytes) // 8 * 8))
    if chip["two_cores"] and BT >= 128:
        tb_budget = min(tb_budget, max(8, _round_up(pl.cdiv(BT, 2), 8)))

    if tile_rows is not None:
        tb, bt_pad = tile_rows, _round_up(BT, tile_rows)
    else:
        tb, bt_pad = _pick_tile(BT, tb_budget, 8)
    if bt_pad != BT:
        x_3d = jnp.pad(x_3d, ((0, bt_pad - BT), (0, 0), (0, 0)))

    kernel = functools.partial(_general_kernel, tb=tb, n=N, w_first=w_first)
    out = pl.pallas_call(
        kernel,
        out_shape=jax.ShapeDtypeStruct((bt_pad, N, c_out), jnp.float32),
        grid_spec=pltpu.PrefetchScalarGridSpec(
            num_scalar_prefetch=0,
            grid=(bt_pad // tb,),
            in_specs=[
                pl.BlockSpec((N, N), lambda i: (0, 0)),            # gso (shared)
                pl.BlockSpec((c_in, c_out), lambda i: (0, 0)),     # weight (shared)
                pl.BlockSpec((1, c_out), lambda i: (0, 0)),        # bias (shared)
                pl.BlockSpec((tb, N, c_in), lambda i: (i, 0, 0)),  # x slices
            ],
            out_specs=pl.BlockSpec((tb, N, c_out), lambda i: (i, 0, 0)),
            scratch_shapes=[pltpu.VMEM((tb, N, c_mid), jnp.float32)],
        ),
        compiler_params=pltpu.CompilerParams(
            dimension_semantics=("parallel",),
            vmem_limit_bytes=chip["vmem_limit"],
            allow_input_fusion=[False, False, False, True],
        ),
    )(gso, weight, bias_row, x_3d)
    return out[:BT] if bt_pad != BT else out


# ---------------------------------------------------------------------------
# Public wrapper (matches the PyTorch module's forward).
# ---------------------------------------------------------------------------
def graph_conv(x, gso, weight, bias=None, *, path=None, compute_dtype=None,
               tile_rows=None):
    """x: (B, c_in, T, N) f32.  Returns (B, T, N, c_out) f32."""
    B, c_in, T, N = x.shape
    c_out = weight.shape[1]
    BT = B * T
    if bias is None:
        bias = jnp.zeros((c_out,), jnp.float32)
    chip = _chip_info()

    # NCHW -> (B, T, N, c_in).  With allow_input_fusion on the x operand, XLA
    # may fold this permute/reshape into the pallas_call input DMA.
    x_p = jnp.transpose(x, (0, 2, 3, 1))

    if path is None:
        K, L_pad = N * c_in, _round_up(N * c_out, 128)
        kron_bytes = 4 * K * L_pad
        # fused arithmetic intensity (matmul flops per streamed row byte):
        # only fuse while the kron FLOP inflation stays under HBM roofline.
        ai = (2.0 * K * L_pad) / (4.0 * (K + L_pad))
        path = "fused" if (kron_bytes <= (2 << 20) and ai <= chip["ridge"]) \
            else "general"

    if path == "fused":
        out_flat = _graph_conv_fused(
            x_p.reshape(BT, N * c_in), gso, weight, bias, BT=BT, N=N,
            c_in=c_in, c_out=c_out, chip=chip, compute_dtype=compute_dtype,
            tile_rows=tile_rows)
        return out_flat.reshape(B, T, N, c_out)

    out_3d = _graph_conv_general(
        x_p.reshape(BT, N, c_in), gso, weight, bias, BT=BT, N=N,
        c_in=c_in, c_out=c_out, chip=chip, tile_rows=tile_rows)
    return out_3d.reshape(B, T, N, c_out)


def reference(x, gso, weight, bias):
    x_p = jnp.transpose(x, (0, 2, 3, 1))
    first = jnp.einsum('hi,btij->bthj', gso, x_p)
    second = jnp.einsum('bthi,ij->bthj', first, weight)
    return second + bias


if __name__ == "__main__":
    B, c_in, T, N = 2, 4, 8, 16
    c_out = 6

    key = jax.random.PRNGKey(0)
    k_x, k_g, k_w, k_b, k_x2 = jax.random.split(key, 5)

    # parameters (mimics reset_parameters: U(-stdv, stdv), stdv = 1/sqrt(c_out))
    stdv = 1.0 / math.sqrt(c_out)
    weight = jax.random.uniform(k_w, (c_in, c_out), jnp.float32, -stdv, stdv)
    bias = jax.random.uniform(k_b, (c_out,), jnp.float32, -stdv, stdv)

    # deterministic graph shift operator (symmetric, row-normalized)
    adj = jax.random.uniform(k_g, (N, N), jnp.float32)
    adj = 0.5 * (adj + adj.T)
    gso = adj / jnp.sum(adj, axis=1, keepdims=True)

    # input in NCHW layout, as the PyTorch module expects
    x = jax.random.normal(k_x, (B, c_in, T, N), jnp.float32)
    ref = reference(x, gso, weight, bias)

    # Fused (small-graph) path — the one selected automatically here.
    out_fused = jax.block_until_ready(graph_conv(x, gso, weight, bias, path="fused"))
    assert out_fused.shape == (B, T, N, c_out)
    assert jnp.allclose(out_fused, ref, atol=1e-4, rtol=1e-4), "fused path mismatch"

    # General (large-graph) fallback path, validated at the same small shapes.
    out_gen = jax.block_until_ready(graph_conv(x, gso, weight, bias, path="general"))
    assert out_gen.shape == (B, T, N, c_out)
    assert jnp.allclose(out_gen, ref, atol=1e-4, rtol=1e-4), "general path mismatch"

    # Multi-tile grids (forced tile that divides BT -> exercises the grid, no pad).
    B2, T2 = 4, 16
    x2 = jax.random.normal(k_x2, (B2, c_in, T2, N), jnp.float32)
    ref2 = reference(x2, gso, weight, bias)
    out2_f = jax.block_until_ready(
        graph_conv(x2, gso, weight, bias, path="fused", tile_rows=16))
    assert jnp.allclose(out2_f, ref2, atol=1e-4, rtol=1e-4), "fused multi-tile mismatch"
    out2_g = jax.block_until_ready(
        graph_conv(x2, gso, weight, bias, path="general", tile_rows=16))
    assert jnp.allclose(out2_g, ref2, atol=1e-4, rtol=1e-4), "general multi-tile mismatch"

    # Optional bf16 streaming (halves HBM read traffic; f32 accumulation).
    out_bf16 = jax.block_until_ready(
        graph_conv(x, gso, weight, bias, path="fused", compute_dtype=jnp.bfloat16))
    assert jnp.allclose(out_bf16, ref, atol=5e-2, rtol=5e-2), "bf16 path mismatch"

    print("KERNEL_OK")
</pallas_src>

<mosaic_0001>
module attributes {stable_mosaic.version = 11 : i64} {
  func.func @_fused_kernel(%arg0: i32, %arg1: memref<16x64xf32, #tpu.memory_space<vmem>>, %arg2: memref<64x128xf32, #tpu.memory_space<vmem>>, %arg3: memref<1x128xf32, #tpu.memory_space<vmem>>, %arg4: memref<16x128xf32, #tpu.memory_space<vmem>>) attributes {dimension_semantics = [#tpu.dimension_semantics<parallel>], iteration_bounds = array<i64: 1>, scalar_prefetch = 0 : i64, scratch_operands = 0 : i64, tpu.core_type = #tpu.core_type<tc>, window_params = [{transform_indices = @transform_0, window_bounds = array<i64: 16, 64>}, {pipeline_mode = #tpu.pipeline_mode<synchronous>, transform_indices = @transform_1, window_bounds = array<i64: 64, 128>}, {pipeline_mode = #tpu.pipeline_mode<synchronous>, transform_indices = @transform_2, window_bounds = array<i64: 1, 128>}, {transform_indices = @transform_3, window_bounds = array<i64: 16, 128>}]} {
    %c0 = arith.constant 0 : index
    %c0_0 = arith.constant 0 : index
    %0 = vector.load %arg1[%c0, %c0_0] : memref<16x64xf32, #tpu.memory_space<vmem>>, vector<16x64xf32>
    %c0_1 = arith.constant 0 : index
    %c0_2 = arith.constant 0 : index
    %1 = vector.load %arg2[%c0_1, %c0_2] : memref<64x128xf32, #tpu.memory_space<vmem>>, vector<64x128xf32>
    %cst = arith.constant dense<0.000000e+00> : vector<16x128xf32>
    %2 = tpu.matmul %0, %1, %cst {dimension_numbers = #tpu.dot_dimension_numbers<[1], [0], [0], [1], [0, 0, 1, 1], [], []>} : vector<16x64xf32>, vector<64x128xf32>, vector<16x128xf32> -> vector<16x128xf32>
    %c0_3 = arith.constant 0 : index
    %c0_4 = arith.constant 0 : index
    %3 = vector.load %arg3[%c0_3, %c0_4] : memref<1x128xf32, #tpu.memory_space<vmem>>, vector<1x128xf32>
    %4 = vector.broadcast %3 : vector<1x128xf32> to vector<16x128xf32>
    %5 = arith.addf %2, %4 : vector<16x128xf32>
    %c0_5 = arith.constant 0 : index
    %c0_6 = arith.constant 0 : index
    %6 = vector.load %arg4[%c0_5, %c0_6] : memref<16x128xf32, #tpu.memory_space<vmem>>, vector<16x128xf32>
    tpu.vector_store %arg4[%c0_5, %c0_6], %5 {strides = array<i32>} : memref<16x128xf32, #tpu.memory_space<vmem>>, vector<16x128xf32>,
    return
  }
  func.func @transform_0(%arg0: i32) -> (i32, i32) {
    %c0_i32 = arith.constant 0 : i32
    %c0_i32_0 = arith.constant 0 : i32
    return %arg0, %c0_i32 : i32, i32
  }
  func.func @transform_1(%arg0: i32) -> (i32, i32) {
    %c0_i32 = arith.constant 0 : i32
    %c0_i32_0 = arith.constant 0 : i32
    %c0_i32_1 = arith.constant 0 : i32
    return %c0_i32, %c0_i32_0 : i32, i32
  }
  func.func @transform_2(%arg0: i32) -> (i32, i32) {
    %c0_i32 = arith.constant 0 : i32
    %c0_i32_0 = arith.constant 0 : i32
    %c0_i32_1 = arith.constant 0 : i32
    return %c0_i32, %c0_i32_0 : i32, i32
  }
  func.func @transform_3(%arg0: i32) -> (i32, i32) {
    %c0_i32 = arith.constant 0 : i32
    %c0_i32_0 = arith.constant 0 : i32
    return %arg0, %c0_i32 : i32, i32
  }
}

</mosaic_0001>

<bundles_post_ra>
// kernel: tpu_custom_call.1
= control target key start
LH: loop header
LB: loop body
LE: loop exit
PB: predicated region body
PF: predicated region fallthrough
CT: control target
= control target key end

     0   :  { %8 = vsyncpa [#allocation3], 0  ;;  %s253_s0 = inlined_call_operand.hbm [shape: f32[16,64], index: 0, kind: input, shape index: {}]   ;;  %s254_s1 = inlined_call_operand.hbm [shape: f32[64,128], index: 1, kind: input, shape index: {}]   ;;  %s255_s2 = inlined_call_operand.vmem [shape: f32[1,128], index: 2, kind: input, shape index: {}]   ;;  %s256_s3 = inlined_call_operand.hbm [shape: f32[16,128], index: 3, kind: output, shape index: {}]  }
   0x1   :  { %9 = vsyncpa [#allocation6], 0 }
   0x2   :  { %10 = vsyncpa [#allocation4], 0  ;;  %s15_s14 = sshll.u32 %s253_s0, 4  ;;  %s207_s15 = smov [#allocation2]   ;;  %s16_s14 = int_to_ptr.hbm [resolvable:$true] %s15_s14 }
   0x3   :  { %s17_s16 = sshll.u32 %s207_s15, 4  ;;  %s28_s19 = sshll.u32 %s254_s1, 4  ;;  %s18_s16 = int_to_ptr.vmem [resolvable:$true] %s17_s16  ;;  %s29_s19 = int_to_ptr.hbm [resolvable:$true] %s28_s19 }
   0x4   :  { %s208_s20 = smov 128   ;;  %s209_s21 = smov 8  }
   0x5   :  { %23 = dma.hbm_to_vmem [thread:$0]  %s16_s14, 256, %s18_s16, [#allocation3], %s208_s20, %s208_s20, %s209_s21  }
   0x6   :  { %s210_s22 = smov [#allocation5]  }
   0x7   :  { %s30_s23 = sshll.u32 %s210_s22, 4  ;;  %s31_s23 = int_to_ptr.vmem [resolvable:$true] %s30_s23 }
   0x8   :  { %36 = dma.hbm_to_vmem [thread:$0]  %s29_s19, 1024, %s31_s23, [#allocation6], %s208_s20, %s208_s20, %s209_s21  }
   0x9   :  { %201 = dma.done.wait [#allocation3], 256  }
   0xa   :  { %202 = vsyncadd [#allocation3], 4294967040 }
   0xb   :  { %203 = dma.done.wait [#allocation6], 1024  }
   0xc   :  { %204 = vsyncadd [#allocation6], 4294966272  ;;  %v56_v0 = vld [vmem:[#allocation5 + $0x38] sm:$0xff]  ;;  %v55_v1 = vld [vmem:[#allocation5 + $0x30] sm:$0xff]  ;;  %vm61_vm0 = vcmask 523264   ;;  %s211_s24 = smov [#allocation7]  }
   0xd   :  { %76 = vmatpush.msra.mxu0 %v56_v0  ;;  %115 = vmatpush.msra.mxu1 %v56_v0  ;;  %v54_v2 = vld [vmem:[#allocation5 + $0x28] sm:$0xff]  ;;  %v53_v3 = vld [vmem:[#allocation5 + $0x20] sm:$0xff]  ;;  %v52_v4 = vld [vmem:[#allocation5 + $0x18] sm:$0xff]  ;;  %s97_s25 = sshll.u32 %s211_s24, 4  ;;  %s99_s28 = sshll.u32 %s256_s3, 4  ;;  %s98_s25 = int_to_ptr.vmem [resolvable:$true] %s97_s25  ;;  %s100_s28 = int_to_ptr.hbm [resolvable:$true] %s99_s28 }
   0xe   :  { %v51_v5 = vld [vmem:[#allocation5 + $0x10] sm:$0xff]  ;;  %v50_v6 = vld [vmem:[#allocation5 + $0x8] sm:$0xff]  ;;  %v49_v7 = vld [vmem:[#allocation5] sm:$0xff] }
   0xf   :  { %77 = vmatpush.msra.mxu0 %v55_v1  ;;  %116 = vmatpush.msra.mxu1 %v55_v1  ;;  %v47_v8 = vld [vmem:[#allocation2] sm:$0xff]  ;;  %v48_v9 = vld [vmem:[#allocation2 + $0x8] sm:$0xff] }
  0x10   :  { %v128_v10 = vld [vmem:[%s255_s2] ss:$0 sm:$0xff] }
  0x11   :  { %78 = vmatpush.msra.mxu0 %v54_v2  ;;  %117 = vmatpush.msra.mxu1 %v54_v2 }
  0x13   :  { %79 = vmatpush.msra.mxu0 %v53_v3  ;;  %118 = vmatpush.msra.mxu1 %v53_v3 }
  0x15   :  { %80 = vmatpush.msra.mxu0 %v52_v4  ;;  %119 = vmatpush.msra.mxu1 %v52_v4 }
  0x17   :  { %81 = vmatpush.msra.mxu0 %v51_v5  ;;  %120 = vmatpush.msra.mxu1 %v51_v5 }
  0x19   :  { %82 = vmatpush.msra.mxu0 %v50_v6  ;;  %121 = vmatpush.msra.mxu1 %v50_v6 }
  0x1b   :  { %83 = vmatpush.msra.mxu0 %v49_v7  ;;  %122 = vmatpush.msra.mxu1 %v49_v7 }
  0x1c   :  { %113 = vmatmul.msk.f32.vlgmr.msra.gmra.mxu0 %vm61_vm0, %v47_v8  ;;  %114 = vmatmul.msk.f32.vlgmr.msra.gmra.mxu1 %vm61_vm0, %v48_v9 }
  0x99   :  { %v85_v11 = vpop.f32.mrf.mxu0  ;;  %v88_v12 = vpop.f32.mrf.mxu1 }
  0x9a   :  { %v86_v13 = vadd.f32 %v128_v10, %v85_v11  ;;  %v89_v14 = vadd.f32 %v128_v10, %v88_v12 }
  0x9c   :  { %91 = vst [vmem:[#allocation7] sm:$0xff] %v86_v13 }
  0x9d   :  { %92 = vst [vmem:[#allocation7 + $0x8] sm:$0xff] %v89_v14 }
  0x9e   :  { %105 = dma.vmem_to_hbm [thread:$0]  %s98_s25, 256, %s100_s28, [#allocation4], %s208_s20, %s208_s20, %s209_s21  }
  0x9f   :  { %205 = dma.done.wait [#allocation4], 256  }
  0xa0   :  { %206 = vsyncadd [#allocation4], 4294967040 }
  0xa1   :  { %110 = vsyncpa [#allocation3], 1 }
  0xa2   :  { %111 = vsyncpa [#allocation6], 1 }
  0xa3   :  { %112 = vsyncpa [#allocation4], 1 }

</bundles_post_ra>
